<compile_context>
chip_gen: v5e
topology: v5e:2x2
jax: 0.10.0
libtpu: 0.0.40
codegen_flags: <defaults>
</compile_context>

<pallas_src>
import jax
import jax.numpy as jnp
from jax.experimental import pallas as pl
from jax.experimental.pallas import tpu as pltpu

N_IN = 28 * 28    # 784
HID = 128
N_OUT = 10


def mlp_kernel(x_ref, w1_ref, b1_ref, w2_ref, b2_ref, o_ref):
    # x arrives as f32 straight from HBM (no wrapper pad/cast pass);
    # the VPU cast to bf16 is hidden under the x DMA (kernel is HBM-bound).
    x = x_ref[...].astype(jnp.bfloat16)                               # (TB, 784)

    # Linear 1 + ReLU: bf16 MXU inputs, f32 accumulation, f32 epilogue.
    h = jnp.dot(x, w1_ref[...], preferred_element_type=jnp.float32)   # (TB, 128)
    h = jnp.maximum(h + b1_ref[...], 0.0)

    # Linear 2: N=10 directly (MXU has enormous slack; output stays narrow).
    logits = jnp.dot(h.astype(jnp.bfloat16), w2_ref[...],
                     preferred_element_type=jnp.float32)               # (TB, 10)
    logits = logits + b2_ref[...]

    # Numerically-stable log-softmax over the 10 classes.
    m = jnp.max(logits, axis=-1, keepdims=True)
    shifted = logits - m
    lse = jnp.log(jnp.sum(jnp.exp(shifted), axis=-1, keepdims=True))
    o_ref[...] = (shifted - lse).astype(o_ref.dtype)


def mlp_forward(x, w1, b1, w2, b2, *, block_b=2048):
    """x: (B, 1, 28, 28) or (B, 784) f32. w1: (784,128), b1: (1,128),
    w2: (128,10), b2: (1,10). Returns log-probs (B, 10) in f32."""
    B = x.shape[0]
    x2d = x.reshape(B, -1)                    # free metadata reshape, keep f32
    assert x2d.shape[1] == N_IN
    if x2d.dtype not in (jnp.float32, jnp.bfloat16):
        x2d = x2d.astype(jnp.float32)

    # Batch tile: multiple of 8 sublanes, large enough to amortize the
    # ~0.35 us fixed per-grid-step overhead.
    tb = max(8, min(block_b, B))
    tb = ((tb + 7) // 8) * 8
    b_pad = ((B + tb - 1) // tb) * tb
    n_tiles = b_pad // tb
    if b_pad != B:                            # pad batch only when needed
        x2d = jnp.pad(x2d, ((0, b_pad - B), (0, 0)))

    # One-time, tiny weight prep (w1 is only 392 KiB).
    w1_p = w1.astype(jnp.bfloat16)                   # (784, 128)
    b1_p = b1.reshape(1, HID).astype(jnp.float32)    # (1, 128)
    w2_p = w2.astype(jnp.bfloat16)                   # (128, 10)
    b2_p = b2.reshape(1, N_OUT).astype(jnp.float32)  # (1, 10)

    out = pl.pallas_call(
        mlp_kernel,
        out_shape=jax.ShapeDtypeStruct((b_pad, N_OUT), jnp.float32),
        grid_spec=pltpu.PrefetchScalarGridSpec(
            num_scalar_prefetch=0,
            grid=(n_tiles,),
            in_specs=[
                # Streamed x tiles; last dim 784 == full array dim (legal),
                # Mosaic lane-pads to 896 inside VMEM for free.
                pl.BlockSpec((tb, N_IN), lambda i: (i, 0)),
                # VMEM-resident weights / biases (constant index_map -> no re-DMA).
                pl.BlockSpec((N_IN, HID), lambda i: (0, 0)),
                pl.BlockSpec((1, HID), lambda i: (0, 0)),
                pl.BlockSpec((HID, N_OUT), lambda i: (0, 0)),
                pl.BlockSpec((1, N_OUT), lambda i: (0, 0)),
            ],
            # Natural (tb, 10) output: 40 B/row written instead of 512 B/row.
            out_specs=pl.BlockSpec((tb, N_OUT), lambda i: (i, 0)),
        ),
        compiler_params=pltpu.CompilerParams(
            dimension_semantics=("parallel",),      # independent batch tiles
            vmem_limit_bytes=48 * 1024 * 1024,      # needed above v5e's 16 MiB default
        ),
    )(x2d, w1_p, b1_p, w2_p, b2_p)

    return out[:B] if b_pad != B else out


def init_params(key):
    k1, k2, k3, k4 = jax.random.split(key, 4)
    # PyTorch-Linear-like uniform init U(-1/sqrt(fan_in), 1/sqrt(fan_in)).
    lim1 = 1.0 / jnp.sqrt(784.0)
    lim2 = 1.0 / jnp.sqrt(128.0)
    w1 = jax.random.uniform(k1, (N_IN, HID), jnp.float32, -lim1, lim1)
    b1 = jax.random.uniform(k2, (1, HID), jnp.float32, -lim1, lim1)
    w2 = jax.random.uniform(k3, (HID, N_OUT), jnp.float32, -lim2, lim2)
    b2 = jax.random.uniform(k4, (1, N_OUT), jnp.float32, -lim2, lim2)
    return w1, b1, w2, b2


def reference_forward_bf16(x, w1, b1, w2, b2):
    """Pure-JAX reference matching the kernel's mixed precision (bf16 MXU
    inputs, f32 accumulation and epilogue)."""
    B = x.shape[0]
    x2d = x.reshape(B, -1).astype(jnp.float32)
    h = jnp.dot(x2d.astype(jnp.bfloat16), w1.astype(jnp.bfloat16),
                preferred_element_type=jnp.float32) + b1
    h = jnp.maximum(h, 0.0)
    logits = jnp.dot(h.astype(jnp.bfloat16), w2.astype(jnp.bfloat16),
                     preferred_element_type=jnp.float32) + b2
    return jax.nn.log_softmax(logits, axis=1)


def reference_forward_f32(x, w1, b1, w2, b2):
    """Full-f32 reference (original PyTorch-module semantics)."""
    B = x.shape[0]
    x2d = x.reshape(B, -1).astype(jnp.float32)
    h = jnp.maximum(x2d @ w1 + b1, 0.0)
    logits = h @ w2 + b2
    return jax.nn.log_softmax(logits, axis=1)


if __name__ == "__main__":
    key = jax.random.PRNGKey(0)
    kx, kp = jax.random.split(key)

    B = 8
    x = jax.random.normal(kx, (B, 1, 28, 28), jnp.float32)   # NCHW, like MNIST
    w1, b1, w2, b2 = init_params(kp)

    out = mlp_forward(x, w1, b1, w2, b2)
    out = jax.block_until_ready(out)
    assert out.shape == (B, N_OUT)

    # Tight check against a reference with identical mixed precision.
    ref_bf16 = reference_forward_bf16(x, w1, b1, w2, b2)
    assert jnp.allclose(out, ref_bf16, atol=2e-3, rtol=2e-3), "mismatch vs bf16 reference"

    # Loose sanity check against the full-f32 module semantics.
    ref_f32 = reference_forward_f32(x, w1, b1, w2, b2)
    assert jnp.allclose(out, ref_f32, atol=5e-2, rtol=5e-2), "mismatch vs f32 reference"

    print("KERNEL_OK")
</pallas_src>

<mosaic_0001>
module attributes {stable_mosaic.version = 11 : i64} {
  func.func @mlp_kernel(%arg0: i32, %arg1: memref<8x784xf32, #tpu.memory_space<vmem>>, %arg2: memref<784x128xbf16, #tpu.memory_space<vmem>>, %arg3: memref<1x128xf32, #tpu.memory_space<vmem>>, %arg4: memref<128x10xbf16, #tpu.memory_space<vmem>>, %arg5: memref<1x10xf32, #tpu.memory_space<vmem>>, %arg6: memref<8x10xf32, #tpu.memory_space<vmem>>) attributes {dimension_semantics = [#tpu.dimension_semantics<parallel>], iteration_bounds = array<i64: 1>, scalar_prefetch = 0 : i64, scratch_operands = 0 : i64, tpu.core_type = #tpu.core_type<tc>, window_params = [{transform_indices = @transform_0, window_bounds = array<i64: 8, 784>}, {pipeline_mode = #tpu.pipeline_mode<synchronous>, transform_indices = @transform_1, window_bounds = array<i64: 784, 128>}, {pipeline_mode = #tpu.pipeline_mode<synchronous>, transform_indices = @transform_2, window_bounds = array<i64: 1, 128>}, {pipeline_mode = #tpu.pipeline_mode<synchronous>, transform_indices = @transform_3, window_bounds = array<i64: 128, 10>}, {pipeline_mode = #tpu.pipeline_mode<synchronous>, transform_indices = @transform_4, window_bounds = array<i64: 1, 10>}, {transform_indices = @transform_5, window_bounds = array<i64: 8, 10>}]} {
    %c0 = arith.constant 0 : index
    %c0_0 = arith.constant 0 : index
    %0 = vector.load %arg1[%c0, %c0_0] : memref<8x784xf32, #tpu.memory_space<vmem>>, vector<8x784xf32>
    %1 = arith.truncf %0 : vector<8x784xf32> to vector<8x784xbf16>
    %c0_1 = arith.constant 0 : index
    %c0_2 = arith.constant 0 : index
    %2 = vector.load %arg2[%c0_1, %c0_2] : memref<784x128xbf16, #tpu.memory_space<vmem>>, vector<784x128xbf16>
    %cst = arith.constant dense<0.000000e+00> : vector<8x128xf32>
    %3 = tpu.matmul %1, %2, %cst {dimension_numbers = #tpu.dot_dimension_numbers<[1], [0], [0], [1], [0, 0, 1, 1], [], []>} : vector<8x784xbf16>, vector<784x128xbf16>, vector<8x128xf32> -> vector<8x128xf32>
    %c0_3 = arith.constant 0 : index
    %c0_4 = arith.constant 0 : index
    %4 = vector.load %arg3[%c0_3, %c0_4] : memref<1x128xf32, #tpu.memory_space<vmem>>, vector<1x128xf32>
    %5 = vector.broadcast %4 : vector<1x128xf32> to vector<8x128xf32>
    %6 = arith.addf %3, %5 : vector<8x128xf32>
    %cst_5 = arith.constant 0.000000e+00 : f32
    %7 = vector.broadcast %cst_5 : f32 to vector<8x128xf32>
    %8 = arith.maximumf %6, %7 : vector<8x128xf32>
    %9 = arith.truncf %8 : vector<8x128xf32> to vector<8x128xbf16>
    %c0_6 = arith.constant 0 : index
    %c0_7 = arith.constant 0 : index
    %10 = vector.load %arg4[%c0_6, %c0_7] : memref<128x10xbf16, #tpu.memory_space<vmem>>, vector<128x10xbf16>
    %cst_8 = arith.constant dense<0.000000e+00> : vector<8x10xf32>
    %11 = tpu.matmul %9, %10, %cst_8 {dimension_numbers = #tpu.dot_dimension_numbers<[1], [0], [0], [1], [0, 0, 1, 1], [], []>} : vector<8x128xbf16>, vector<128x10xbf16>, vector<8x10xf32> -> vector<8x10xf32>
    %c0_9 = arith.constant 0 : index
    %c0_10 = arith.constant 0 : index
    %12 = vector.load %arg5[%c0_9, %c0_10] : memref<1x10xf32, #tpu.memory_space<vmem>>, vector<1x10xf32>
    %13 = vector.broadcast %12 : vector<1x10xf32> to vector<8x10xf32>
    %14 = arith.addf %11, %13 : vector<8x10xf32>
    %cst_11 = arith.constant dense<0xFF800000> : vector<8xf32>
    %15 = vector.multi_reduction <maximumf>, %14, %cst_11 [1] : vector<8x10xf32> to vector<8xf32>
    %16 = vector.shape_cast %15 : vector<8xf32> to vector<8x1xf32>
    %17 = vector.broadcast %16 : vector<8x1xf32> to vector<8x10xf32>
    %18 = arith.subf %14, %17 : vector<8x10xf32>
    %19 = math.exp %18 : vector<8x10xf32>
    %cst_12 = arith.constant dense<0.000000e+00> : vector<8xf32>
    %20 = vector.multi_reduction <add>, %19, %cst_12 [1] : vector<8x10xf32> to vector<8xf32>
    %21 = vector.shape_cast %20 : vector<8xf32> to vector<8x1xf32>
    %22 = math.log %21 : vector<8x1xf32>
    %23 = vector.broadcast %22 : vector<8x1xf32> to vector<8x10xf32>
    %24 = arith.subf %18, %23 : vector<8x10xf32>
    %c0_13 = arith.constant 0 : index
    %c0_14 = arith.constant 0 : index
    %25 = vector.load %arg6[%c0_13, %c0_14] : memref<8x10xf32, #tpu.memory_space<vmem>>, vector<8x10xf32>
    tpu.vector_store %arg6[%c0_13, %c0_14], %24 {strides = array<i32>} : memref<8x10xf32, #tpu.memory_space<vmem>>, vector<8x10xf32>,
    return
  }
  func.func @transform_0(%arg0: i32) -> (i32, i32) {
    %c0_i32 = arith.constant 0 : i32
    %c0_i32_0 = arith.constant 0 : i32
    return %arg0, %c0_i32 : i32, i32
  }
  func.func @transform_1(%arg0: i32) -> (i32, i32) {
    %c0_i32 = arith.constant 0 : i32
    %c0_i32_0 = arith.constant 0 : i32
    %c0_i32_1 = arith.constant 0 : i32
    return %c0_i32, %c0_i32_0 : i32, i32
  }
  func.func @transform_2(%arg0: i32) -> (i32, i32) {
    %c0_i32 = arith.constant 0 : i32
    %c0_i32_0 = arith.constant 0 : i32
    %c0_i32_1 = arith.constant 0 : i32
    return %c0_i32, %c0_i32_0 : i32, i32
  }
  func.func @transform_3(%arg0: i32) -> (i32, i32) {
    %c0_i32 = arith.constant 0 : i32
    %c0_i32_0 = arith.constant 0 : i32
    %c0_i32_1 = arith.constant 0 : i32
    return %c0_i32, %c0_i32_0 : i32, i32
  }
  func.func @transform_4(%arg0: i32) -> (i32, i32) {
    %c0_i32 = arith.constant 0 : i32
    %c0_i32_0 = arith.constant 0 : i32
    %c0_i32_1 = arith.constant 0 : i32
    return %c0_i32, %c0_i32_0 : i32, i32
  }
  func.func @transform_5(%arg0: i32) -> (i32, i32) {
    %c0_i32 = arith.constant 0 : i32
    %c0_i32_0 = arith.constant 0 : i32
    return %arg0, %c0_i32 : i32, i32
  }
}

</mosaic_0001>

<bundles_post_ra>
// kernel: tpu_custom_call.1
= control target key start
LH: loop header
LB: loop body
LE: loop exit
PB: predicated region body
PF: predicated region fallthrough
CT: control target
= control target key end

     0   :  { %10 = vsyncpa [#allocation3], 0  ;;  %s1099_s0 = inlined_call_operand.vmem [shape: f32[8,784], index: 0, kind: input, shape index: {}]   ;;  %s1100_s1 = inlined_call_operand.hbm [shape: bf16[784,128], index: 1, kind: input, shape index: {}]   ;;  %s1101_s2 = inlined_call_operand.vmem [shape: f32[1,128], index: 2, kind: input, shape index: {}]   ;;  %s1102_s3 = inlined_call_operand.vmem [shape: bf16[128,10], index: 3, kind: input, shape index: {}]   ;;  %s1103_s4 = inlined_call_operand.vmem [shape: f32[1,10], index: 4, kind: input, shape index: {}]   ;;  %s1104_s5 = inlined_call_operand.hbm [shape: f32[8,10], index: 5, kind: output, shape index: {}]  }
   0x1   :  { %11 = vsyncpa [#allocation4], 0  ;;  %s18_s20 = sshll.u32 %s1100_s1, 4  ;;  %s1005_s21 = smov [#allocation2]   ;;  %s19_s20 = int_to_ptr.hbm [resolvable:$true] %s18_s20 }
   0x2   :  { %s20_s22 = sshll.u32 %s1005_s21, 4  ;;  %s1006_s23 = smov 64   ;;  %s21_s22 = int_to_ptr.vmem [resolvable:$true] %s20_s22 }
   0x3   :  { %s1007_s24 = smov 4  }
   0x4   :  { %26 = dma.hbm_to_vmem [thread:$0]  %s19_s20, 6272, %s21_s22, [#allocation3], %s1006_s23, %s1006_s23, %s1007_s24  }
   0x5   :  { %1001 = dma.done.wait [#allocation3], 6272  }
   0x6   :  { %1002 = vsyncadd [#allocation3], 4294961024  ;;  %v893_v0 = vld [vmem:[#allocation2 + $0x38] sm:$0xff]  ;;  %v892_v3 = vld [vmem:[#allocation2 + $0x30] sm:$0xff]  ;;  %vm448_vm0 = vcmask 130048   ;;  %vm626_vm1 = vcmask 80896  }
   0x7   :  { %v901_v1 = vld [vmem:[#allocation2 + $0x78] sm:$0xff]  ;;  %452 = vmatpush.bf16.msra.mxu0 %v893_v0  ;;  %v900_v4 = vld [vmem:[#allocation2 + $0x70] sm:$0xff]  ;;  %v891_v8 = vld [vmem:[#allocation2 + $0x28] sm:$0xff]  ;;  %s1008_s29 = smov [#allocation5]   ;;  %s647_s7 = sshll.u32 %s1104_s5, 4  ;;  %s648_s7 = int_to_ptr.hbm [resolvable:$true] %s647_s7 }
   0x8   :  { %v909_v2 = vld [vmem:[#allocation2 + $0xb8] sm:$0xff]  ;;  %465 = vmatpush.bf16.msra.mxu1 %v901_v1  ;;  %v908_v5 = vld [vmem:[#allocation2 + $0xb0] sm:$0xff]  ;;  %v899_v9 = vld [vmem:[#allocation2 + $0x68] sm:$0xff] }
   0x9   :  { %478 = vmatpush.bf16.msra.mxu2 %v909_v2  ;;  %v917_v6 = vld [vmem:[#allocation2 + $0xf8] sm:$0xff]  ;;  %v916_v7 = vld [vmem:[#allocation2 + $0xf0] sm:$0xff]  ;;  %v907_v10 = vld [vmem:[#allocation2 + $0xa8] sm:$0xff] }
   0xa   :  { %491 = vmatpush.bf16.msra.mxu3 %v917_v6  ;;  %v915_v11 = vld [vmem:[#allocation2 + $0xe8] sm:$0xff]  ;;  %v890_v12 = vld [vmem:[#allocation2 + $0x20] sm:$0xff]  ;;  %v889_v16 = vld [vmem:[#allocation2 + $0x18] sm:$0xff] }
   0xb   :  { %453 = vmatpush.bf16.msra.mxu0 %v892_v3  ;;  %v898_v13 = vld [vmem:[#allocation2 + $0x60] sm:$0xff]  ;;  %v897_v17 = vld [vmem:[#allocation2 + $0x58] sm:$0xff]  ;;  %v888_v20 = vld [vmem:[#allocation2 + $0x10] sm:$0xff] }
   0xc   :  { %466 = vmatpush.bf16.msra.mxu1 %v900_v4  ;;  %v906_v14 = vld [vmem:[#allocation2 + $0xa0] sm:$0xff]  ;;  %v905_v18 = vld [vmem:[#allocation2 + $0x98] sm:$0xff]  ;;  %v896_v21 = vld [vmem:[#allocation2 + $0x50] sm:$0xff] }
   0xd   :  { %479 = vmatpush.bf16.msra.mxu2 %v908_v5  ;;  %v914_v15 = vld [vmem:[#allocation2 + $0xe0] sm:$0xff]  ;;  %v913_v19 = vld [vmem:[#allocation2 + $0xd8] sm:$0xff]  ;;  %v904_v22 = vld [vmem:[#allocation2 + $0x90] sm:$0xff] }
   0xe   :  { %492 = vmatpush.bf16.msra.mxu3 %v916_v7  ;;  %v912_v23 = vld [vmem:[#allocation2 + $0xd0] sm:$0xff]  ;;  %v887_v24 = vld [vmem:[#allocation2 + $0x8] sm:$0xff]  ;;  %v886_v27 = vld [vmem:[#allocation2] sm:$0xff] }
   0xf   :  { %454 = vmatpush.bf16.msra.mxu0 %v891_v8  ;;  %v895_v25 = vld [vmem:[#allocation2 + $0x48] sm:$0xff]  ;;  %v894_v29 = vld [vmem:[#allocation2 + $0x40] sm:$0xff]  ;;  %v925_v32 = vld [vmem:[#allocation2 + $0x138] sm:$0xff] }
  0x10   :  { %467 = vmatpush.bf16.msra.mxu1 %v899_v9  ;;  %v903_v26 = vld [vmem:[#allocation2 + $0x88] sm:$0xff]  ;;  %v38_v30 = vld [vmem:[%s1099_s0] sm:$0xff]  ;;  %v933_v33 = vld [vmem:[#allocation2 + $0x178] sm:$0xff] }
  0x11   :  { %480 = vmatpush.bf16.msra.mxu2 %v907_v10  ;;  %v911_v28 = vld [vmem:[#allocation2 + $0xc8] sm:$0xff]  ;;  %v902_v34 = vld [vmem:[#allocation2 + $0x80] sm:$0xff]  ;;  %v40_v35 = vld [vmem:[%s1099_s0 + $0x10] sm:$0xff]  ;;  %v45_v36 = vpack.c.bf16 %v38_v30, %v38_v30 }
  0x12   :  { %493 = vmatpush.bf16.msra.mxu3 %v915_v11  ;;  %v39_v31 = vld [vmem:[%s1099_s0 + $0x8] sm:$0xff]  ;;  %v910_v38 = vld [vmem:[#allocation2 + $0xc0] sm:$0xff]  ;;  %v41_v40 = vld [vmem:[%s1099_s0 + $0x18] sm:$0xff]  ;;  %v47_v43 = vpack.c.bf16 %v40_v35, %v40_v35 }
  0x13   :  { %455 = vmatpush.bf16.msra.mxu0 %v890_v12  ;;  %v46_v37 = vpack.c.bf16 %v39_v31, %v39_v31  ;;  %v934_v39 = vld [vmem:[#allocation2 + $0x180] sm:$0xff]  ;;  %v924_v41 = vld [vmem:[#allocation2 + $0x130] sm:$0xff]  ;;  %v48_v44 = vpack.c.bf16 %v41_v40, %v41_v40  ;;  %v923_v45 = vld [vmem:[#allocation2 + $0x128] sm:$0xff] }
  0x14   :  { %468 = vmatpush.bf16.msra.mxu1 %v898_v13  ;;  %v932_v42 = vld [vmem:[#allocation2 + $0x170] sm:$0xff]  ;;  %v931_v46 = vld [vmem:[#allocation2 + $0x168] sm:$0xff]  ;;  %v922_v47 = vld [vmem:[#allocation2 + $0x120] sm:$0xff] }
  0x15   :  { %481 = vmatpush.bf16.msra.mxu2 %v906_v14  ;;  %v930_v48 = vld [vmem:[#allocation2 + $0x160] sm:$0xff]  ;;  %v921_v49 = vld [vmem:[#allocation2 + $0x118] sm:$0xff]  ;;  %v44_v51 = vld [vmem:[%s1099_s0 + $0x30] sm:$0xff] }
  0x16   :  { %494 = vmatpush.bf16.msra.mxu3 %v914_v15  ;;  %v929_v50 = vld [vmem:[#allocation2 + $0x158] sm:$0xff]  ;;  %v920_v52 = vld [vmem:[#allocation2 + $0x110] sm:$0xff]  ;;  %v51_v54 = vpack.c.bf16 %v44_v51, %v44_v51  ;;  %v919_v55 = vld [vmem:[#allocation2 + $0x108] sm:$0xff] }
  0x17   :  { %456 = vmatpush.bf16.msra.mxu0 %v889_v16  ;;  %v928_v53 = vld [vmem:[#allocation2 + $0x150] sm:$0xff]  ;;  %v927_v56 = vld [vmem:[#allocation2 + $0x148] sm:$0xff]  ;;  %v918_v57 = vld [vmem:[#allocation2 + $0x100] sm:$0xff] }
  0x18   :  { %469 = vmatpush.bf16.msra.mxu1 %v897_v17  ;;  %v926_v58 = vld [vmem:[#allocation2 + $0x140] sm:$0xff]  ;;  %v43_v60 = vld [vmem:[%s1099_s0 + $0x28] sm:$0xff]  ;;  %v942_v63 = vld [vmem:[%s1102_s3 + $0x38] sm:$0xff] }
  0x19   :  { %482 = vmatpush.bf16.msra.mxu2 %v905_v18  ;;  %v42_v59 = vld [vmem:[%s1099_s0 + $0x20] sm:$0xff]  ;;  %v50_v62 = vpack.c.bf16 %v43_v60, %v43_v60  ;;  %v941_v0 = vld [vmem:[%s1102_s3 + $0x30] sm:$0xff]  ;;  %v940_v1 = vld [vmem:[%s1102_s3 + $0x28] sm:$0xff] }
  0x1a   :  { %495 = vmatpush.bf16.msra.mxu3 %v913_v19  ;;  %v49_v61 = vpack.c.bf16 %v42_v59, %v42_v59  ;;  %v939_v2 = vld [vmem:[%s1102_s3 + $0x20] sm:$0xff]  ;;  %v938_v3 = vld [vmem:[%s1102_s3 + $0x18] sm:$0xff]  ;;  %v937_v4 = vld [vmem:[%s1102_s3 + $0x10] sm:$0xff] }
  0x1b   :  { %457 = vmatpush.bf16.msra.mxu0 %v888_v20  ;;  %v936_v5 = vld [vmem:[%s1102_s3 + $0x8] sm:$0xff]  ;;  %v935_v8 = vld [vmem:[%s1102_s3] sm:$0xff] }
  0x1c   :  { %470 = vmatpush.bf16.msra.mxu1 %v896_v21  ;;  %v947_v13 = vld [vmem:[%s1101_s2] ss:$0 sm:$0xff] }
  0x1d   :  { %483 = vmatpush.bf16.msra.mxu2 %v904_v22  ;;  %v948_v31 = vld [vmem:[%s1103_s4] ss:$0 sm:$0xff]  ;;  %s645_s4 = sshll.u32 %s1008_s29, 4  ;;  %s646_s4 = int_to_ptr.vmem [resolvable:$true] %s645_s4 }
  0x1e   :  { %496 = vmatpush.bf16.msra.mxu3 %v912_v23 }
  0x1f   :  { %458 = vmatpush.bf16.msra.mxu0 %v887_v24 }
  0x20   :  { %471 = vmatpush.bf16.msra.mxu1 %v895_v25 }
  0x21   :  { %484 = vmatpush.bf16.msra.mxu2 %v903_v26 }
  0x22   :  { %497 = vmatpush.bf16.msra.mxu3 %v911_v28 }
  0x23   :  { %459 = vmatpush.bf16.msra.mxu0 %v886_v27 }
  0x24   :  { %472 = vmatpush.bf16.msra.mxu1 %v894_v29 }
  0x25   :  { %485 = vmatpush.bf16.msra.mxu2 %v902_v34 }
  0x26   :  { %460 = vmatmul.bf16.vlgmr.msra.gmra.mxu0 %v45_v36  ;;  %498 = vmatpush.bf16.msra.mxu3 %v910_v38 }
  0x27   :  { %504 = vmatpush.bf16.msrb.mxu0 %v925_v32  ;;  %473 = vmatmul.bf16.vlgmr.msra.gmra.mxu1 %v46_v37 }
  0x28   :  { %517 = vmatpush.bf16.msrb.mxu1 %v933_v33  ;;  %486 = vmatmul.bf16.vlgmr.msra.gmra.mxu2 %v47_v43 }
  0x29   :  { %537 = vmatpush.bf16.msrb.mxu2 %v934_v39  ;;  %499 = vmatmul.bf16.vlgmr.msra.gmra.mxu3 %v48_v44 }
  0x2a   :  { %613 = vmatpush.bf16.msrb.mxu3 %v942_v63 }
  0x2b   :  { %505 = vmatpush.bf16.msrb.mxu0 %v924_v41 }
  0x2c   :  { %518 = vmatpush.bf16.msrb.mxu1 %v932_v42 }
  0x2e   :  { %614 = vmatpush.bf16.msrb.mxu3 %v941_v0 }
  0x2f   :  { %506 = vmatpush.bf16.msrb.mxu0 %v923_v45 }
  0x30   :  { %519 = vmatpush.bf16.msrb.mxu1 %v931_v46 }
  0x32   :  { %615 = vmatpush.bf16.msrb.mxu3 %v940_v1 }
  0x33   :  { %507 = vmatpush.bf16.msrb.mxu0 %v922_v47 }
  0x34   :  { %520 = vmatpush.bf16.msrb.mxu1 %v930_v48 }
  0x36   :  { %616 = vmatpush.bf16.msrb.mxu3 %v939_v2 }
  0x37   :  { %508 = vmatpush.bf16.msrb.mxu0 %v921_v49 }
  0x38   :  { %521 = vmatpush.bf16.msrb.mxu1 %v929_v50  ;;  %853 = vmatmul.msk.bf16.vlgmr.msrb.gmra.mxu2 %vm448_vm0, %v51_v54 }
  0x3a   :  { %617 = vmatpush.bf16.msrb.mxu3 %v938_v3 }
  0x3b   :  { %509 = vmatpush.bf16.msrb.mxu0 %v920_v52 }
  0x3c   :  { %522 = vmatpush.bf16.msrb.mxu1 %v928_v53 }
  0x3e   :  { %618 = vmatpush.bf16.msrb.mxu3 %v937_v4 }
  0x3f   :  { %510 = vmatpush.bf16.msrb.mxu0 %v919_v55 }
  0x40   :  { %523 = vmatpush.bf16.msrb.mxu1 %v927_v56 }
  0x42   :  { %619 = vmatpush.bf16.msrb.mxu3 %v936_v5 }
  0x43   :  { %511 = vmatpush.bf16.msrb.mxu0 %v918_v57 }
  0x44   :  { %524 = vmatpush.bf16.msrb.mxu1 %v926_v58 }
  0x46   :  { %512 = vmatmul.bf16.vlgmr.msrb.gmra.mxu0 %v49_v61  ;;  %620 = vmatpush.bf16.msrb.mxu3 %v935_v8 }
  0x47   :  { %525 = vmatmul.bf16.vlgmr.msrb.gmra.mxu1 %v50_v62 }
  0xa3   :  { %v461_v6 = vpop.f32.mrf.mxu0 }
  0xa4   :  { %v474_v7 = vpop.f32.mrf.mxu1  ;;  %v462_v14 = vadd.f32 %v947_v13, %v461_v6 }
  0xa6   :  { %v475_v17 = vadd.f32 %v474_v7, %v462_v14 }
  0xab   :  { %v463_v9 = vpop.f32.mrf.mxu0  ;;  %v487_v11 = vpop.f32.mrf.mxu2 }
  0xac   :  { %v476_v10 = vpop.f32.mrf.mxu1  ;;  %v500_v12 = vpop.f32.mrf.mxu3  ;;  %v488_v18 = vadd.f32 %v487_v11, %v475_v17 }
  0xae   :  { %v501_v20 = vadd.f32 %v500_v12, %v488_v18 }
  0xb3   :  { %v489_v15 = vpop.f32.mrf.mxu2 }
  0xb4   :  { %v502_v16 = vpop.f32.mrf.mxu3 }
  0xbb   :  { %v539_v19 = vpop.f32.mrf.mxu2 }
  0xc3   :  { %v513_v21 = vpop.f32.mrf.mxu0  ;;  %v541_v25 = vpop.f32.mrf.mxu2 }
  0xc4   :  { %v526_v22 = vpop.f32.mrf.mxu1  ;;  %v514_v23 = vadd.f32 %v513_v21, %v501_v20 }
  0xc6   :  { %v527_v24 = vadd.f32 %v526_v22, %v514_v23 }
  0xc8   :  { %v540_v26 = vadd.f32 %v539_v19, %v527_v24 }
  0xca   :  { %v543_v27 = vmax.f32 %v540_v26, 0.0 }
  0xcb   :  { %v515_v28 = vpop.f32.mrf.mxu0 }
  0xcc   :  { %v528_v29 = vpop.f32.mrf.mxu1  ;;  %v544_v30 = vpack.c.bf16 %v543_v27, %v543_v27 }
  0xce   :  { %621 = vmatmul.bf16.vlgmr.msrb.gmra.mxu3 %v544_v30 }
 0x151   :  { %v622_v32 = vpop.f32.mrf.mxu3 }
 0x152   :  { %v623_v33 = vadd.f32 %v948_v31, %v622_v32 }
 0x154   :  { %v627_v34 = vsel %vm626_vm1, %v623_v33, -inf }
 0x155   :  { %628 = vmax.xlane.f32.xlu0 %v627_v34 }
 0x159   :  { %v624_v35 = vpop.f32.mrf.mxu3 }
 0x1c8   :  { %v629_v36 = vpop.xlane.xlu0 %628 }
 0x1c9   :  { %v630_v37 = vsub.f32 %v623_v33, %v629_v36 }
 0x1cb   :  { %v631_v38 = vmul.f32 1.442695, %v630_v37 }
 0x1cd   :  { %949 = vpow2.f32 %v631_v38 }
 0x1d3   :  { %v950_v39 = vpop.eup %949 }
 0x1d4   :  { %v633_v40 = vsel %vm626_vm1, %v950_v39, 0.0 }
 0x1d5   :  { %634 = vadd.xlane.f32.xlu0 %v633_v40 }
 0x248   :  { %v635_v41 = vpop.xlane.xlu0 %634 }
 0x249   :  { %951 = vlog2.f32 %v635_v41 }
 0x24f   :  { %v952_v42 = vpop.eup %951 }
 0x250   :  { %v637_v43 = vmul.f32 0.6931472, %v952_v42 }
 0x252   :  { %v638_v44 = vsub.f32 %v630_v37, %v637_v43 }
 0x254   :  { %639 = vst.msk [vmem:[#allocation5] sm:$0xff] %vm626_vm1, %v638_v44 }
 0x255   :  { %650 = dma.vmem_to_hbm [thread:$0]  %s646_s4, 128, %s648_s7, [#allocation4]  }
 0x256   :  { %1003 = dma.done.wait [#allocation4], 128  }
 0x257   :  { %1004 = vsyncadd [#allocation4], 4294967168 }
 0x258   :  { %655 = vsyncpa [#allocation3], 1 }
 0x259   :  { %656 = vsyncpa [#allocation4], 1 }

</bundles_post_ra>
